<compile_context>
chip_gen: v7x
topology: tpu7x:2x2x1
jax: 0.10.0
libtpu: 0.0.40
codegen_flags: <defaults>
</compile_context>

<pallas_src>
import functools
import math

import jax
import jax.numpy as jnp
from jax.experimental import pallas as pl
from jax.experimental.pallas import tpu as pltpu

# Column layout of the packed per-hidden-channel parameter array.
_WD0, _WD1, _WD2, _EB, _DB, _PB = 0, 1, 2, 3, 4, 5
_CHAN_COLS = 8  # padded to 8 columns (one 8-lane-wide slab)


def _mbconv_kernel(x_ref, we_ref, wp_ref, chan_ref, edge_ref, o_ref, *, n_out):
    """One lane tile: x_ref (Cin, T) f32; T is a whole number of samples."""
    x = x_ref[...]                                            # (Cin, T) f32
    T = x.shape[-1]

    # ---- expand: 1x1 conv (BN scale folded into we) + shift + SiLU ----------
    h = jnp.dot(we_ref[...], x.astype(jnp.bfloat16),
                preferred_element_type=jnp.float32)           # (Hid, T) f32 acc
    h = h + chan_ref[:, _EB:_EB + 1]
    h = h * jax.nn.sigmoid(h)                                 # SiLU (EUP + VPU)

    # ---- depthwise conv k=3, stride=1, pad=1 (BN scale folded into taps) ----
    # Precomputed edge masks (0 at sample starts / ends) kill the circular-roll
    # taps that would otherwise leak across sample boundaries.
    mask_l = edge_ref[0:1, :]                                 # (1, T)
    mask_r = edge_ref[1:2, :]                                 # (1, T)
    d = chan_ref[:, _WD1:_WD1 + 1] * h + chan_ref[:, _DB:_DB + 1]
    d = d + chan_ref[:, _WD0:_WD0 + 1] * (mask_l * pltpu.roll(h, 1, axis=1))
    d = d + chan_ref[:, _WD2:_WD2 + 1] * (mask_r * pltpu.roll(h, T - 1, axis=1))
    d = d * jax.nn.sigmoid(d)                                 # SiLU

    # ---- project: 1x1 conv (BN scale folded into wp) + shift ----------------
    p = jnp.dot(wp_ref[...], d.astype(jnp.bfloat16),
                preferred_element_type=jnp.float32)           # (Cout, T)

    # ---- residual (stride==1, Cin==Cout); dropout identity (drop_rate=0) ----
    o_ref[...] = p + chan_ref[:n_out, _PB:_PB + 1] + x


def _edge_masks(tile, seq):
    """(2, tile) f32: row 0 zero at sample starts, row 1 zero at sample ends."""
    pos = jnp.arange(tile, dtype=jnp.int32) % seq
    return jnp.stack([pos >= 1, pos <= seq - 2], axis=0).astype(jnp.float32)


def mbconv(x, raw_params, *, eps=1e-5):
    """Eval-mode MBConv forward. x: (N, Cin, L) f32 (NCL, PyTorch Conv1d layout)."""
    N, Cin, L = x.shape
    we, wd, wp, ebn, dbn, pbn = raw_params
    Hid = we.shape[0]
    Cout = wp.shape[0]
    assert Cin == Cout, "residual path requires in_channels == out_channels"
    assert wd.shape[1] == 3, "kernel implements kernel_size=3 depthwise conv"
    assert Hid >= Cout, "project shift is packed into the (Hid, 8) param slab"
    # TODO(synk): stride>1 / general kernel_size / expand_ratio==1 variants not implemented.

    # ---- fold BatchNorm (eval mode) into conv weights / per-channel shifts --
    def scale_shift(p):
        g, b, m, v = p
        s = g / jnp.sqrt(v + eps)
        return s, b - m * s

    es, eb = scale_shift(ebn)
    ds, db = scale_shift(dbn)
    ps, pb = scale_shift(pbn)
    we_f = (es[:, None] * we).astype(jnp.bfloat16)            # (Hid, Cin)
    wp_f = (ps[:, None] * wp).astype(jnp.bfloat16)            # (Cout, Hid)
    chan = jnp.zeros((Hid, _CHAN_COLS), jnp.float32)
    chan = chan.at[:, _WD0:_WD2 + 1].set(ds[:, None] * wd)    # scaled dw taps
    chan = chan.at[:, _EB].set(eb)                            # expand shift
    chan = chan.at[:, _DB].set(db)                            # depthwise shift
    chan = chan.at[:Cout, _PB].set(pb)                        # project shift

    # Per-lane f32 working set: double-buffered in/out tiles + ~3 (Hid,T) temps.
    bytes_per_lane = 4 * (2 * Cin + 2 * Cout + 3 * Hid)
    weight_bytes = 2 * (Hid * Cin + Cout * Hid) + 4 * Hid * _CHAN_COLS
    kernel = functools.partial(_mbconv_kernel, n_out=Cout)

    def vmem_limit(est):
        return int(min(max(2 * est, 16 << 20), 32 << 20))

    # ---- Path A: L lane-aligned -> read/write NCL arrays directly -----------
    if L % 128 == 0 and L * bytes_per_lane <= (12 << 20):
        edge = _edge_masks(L, L)
        est = L * bytes_per_lane + weight_bytes + 2 * L * 4 + (1 << 20)
        return pl.pallas_call(
            kernel,
            out_shape=jax.ShapeDtypeStruct((N, Cout, L), jnp.float32),
            grid_spec=pltpu.PrefetchScalarGridSpec(
                num_scalar_prefetch=0,
                grid=(N,),
                in_specs=[
                    pl.BlockSpec((None, Cin, L), lambda n: (n, 0, 0)),
                    pl.BlockSpec((Hid, Cin), lambda n: (0, 0)),
                    pl.BlockSpec((Cout, Hid), lambda n: (0, 0)),
                    pl.BlockSpec((Hid, _CHAN_COLS), lambda n: (0, 0)),
                    pl.BlockSpec((2, L), lambda n: (0, 0)),
                ],
                out_specs=pl.BlockSpec((None, Cout, L), lambda n: (n, 0, 0)),
            ),
            compiler_params=pltpu.CompilerParams(
                dimension_semantics=("parallel",),
                vmem_limit_bytes=vmem_limit(est)),
        )(x, we_f, wp_f, chan, edge)

    # ---- Path B: lane-dense flattened (Cin, N*L) layout, big whole-sample tiles
    total = N * L
    base = (L * 128) // math.gcd(L, 128)          # lcm(L, 128): whole samples, 128-aligned
    num_base = -(-total // base)
    max_by_vmem = max(1, (6 << 20) // (base * bytes_per_lane))
    max_by_target = max(1, 2048 // base)          # ~2048 lanes/step (v7x-safe)
    k = max(1, min(num_base, max_by_vmem, max_by_target))
    # Prefer >= 8 grid steps (pipeline depth) while tiles stay >= 512 lanes.
    while k > 1 and -(-num_base // k) < 8 and (k // 2) * base >= 512:
        k //= 2
    lane_tile = k * base
    P = -(-total // lane_tile) * lane_tile

    x2 = jnp.transpose(x, (1, 0, 2)).reshape(Cin, total)
    x2 = jnp.pad(x2, ((0, 0), (0, P - total)))
    edge = _edge_masks(lane_tile, L)
    est = lane_tile * bytes_per_lane + weight_bytes + 2 * lane_tile * 4 + (1 << 20)

    out = pl.pallas_call(
        kernel,
        out_shape=jax.ShapeDtypeStruct((Cout, P), jnp.float32),
        grid_spec=pltpu.PrefetchScalarGridSpec(
            num_scalar_prefetch=0,
            grid=(P // lane_tile,),
            in_specs=[
                pl.BlockSpec((Cin, lane_tile), lambda i: (0, i)),
                pl.BlockSpec((Hid, Cin), lambda i: (0, 0)),
                pl.BlockSpec((Cout, Hid), lambda i: (0, 0)),
                pl.BlockSpec((Hid, _CHAN_COLS), lambda i: (0, 0)),
                pl.BlockSpec((2, lane_tile), lambda i: (0, 0)),
            ],
            out_specs=pl.BlockSpec((Cout, lane_tile), lambda i: (0, i)),
        ),
        compiler_params=pltpu.CompilerParams(
            dimension_semantics=("parallel",),
            vmem_limit_bytes=vmem_limit(est)),
    )(x2, we_f, wp_f, chan, edge)

    # un-pad and restore NCL layout (only needed when L is not 128-aligned)
    return out[:, :total].reshape(Cout, N, L).transpose(1, 0, 2)


def mbconv_ref(x, raw_params, *, eps=1e-5):
    """Pure-JAX f32 reference of the same eval-mode MBConv forward."""
    we, wd, wp, ebn, dbn, pbn = raw_params

    def bn(t, p):                                             # t: (N, C, L)
        g, b, m, v = p
        s = g / jnp.sqrt(v + eps)
        return t * s[None, :, None] + (b - m * s)[None, :, None]

    silu = lambda t: t * jax.nn.sigmoid(t)
    h = jnp.einsum('hc,ncl->nhl', we, x)
    h = silu(bn(h, ebn))
    hp = jnp.pad(h, ((0, 0), (0, 0), (1, 1)))
    d = (wd[None, :, 0:1] * hp[:, :, :-2]
         + wd[None, :, 1:2] * hp[:, :, 1:-1]
         + wd[None, :, 2:3] * hp[:, :, 2:])
    d = silu(bn(d, dbn))
    p = jnp.einsum('oh,nhl->nol', wp, d)
    p = bn(p, pbn)
    return p + x


def make_params(key, in_channels, out_channels, expand_ratio=4, kernel_size=3):
    """Raw module params: conv weights (bias=False) + BN (gamma, beta, mean, var)."""
    hid = in_channels * expand_ratio
    ks = jax.random.split(key, 6)
    we = 0.1 * jax.random.normal(ks[0], (hid, in_channels), jnp.float32)
    wd = 0.1 * jax.random.normal(ks[1], (hid, kernel_size), jnp.float32)
    wp = 0.1 * jax.random.normal(ks[2], (out_channels, hid), jnp.float32)

    def bn(k, c):
        k1, k2, k3, k4 = jax.random.split(k, 4)
        gamma = 1.0 + 0.1 * jax.random.normal(k1, (c,), jnp.float32)
        beta = 0.1 * jax.random.normal(k2, (c,), jnp.float32)
        mean = 0.1 * jax.random.normal(k3, (c,), jnp.float32)
        var = 0.5 + jnp.abs(jax.random.normal(k4, (c,), jnp.float32))
        return (gamma, beta, mean, var)

    return we, wd, wp, bn(ks[3], hid), bn(ks[4], hid), bn(ks[5], out_channels)


if __name__ == "__main__":
    key = jax.random.PRNGKey(0)
    # Case 1 exercises the flattened lane-dense path (L=16 not 128-aligned);
    # case 2 exercises the direct NCL path (L multiple of 128).
    cases = [(2, 4, 16), (3, 8, 256)]
    for (N, C, L) in cases:
        kx, kp, key = jax.random.split(key, 3)
        x = jax.random.normal(kx, (N, C, L), jnp.float32)
        raw = make_params(kp, C, C, expand_ratio=4, kernel_size=3)

        out = jax.block_until_ready(mbconv(x, raw))
        ref = mbconv_ref(x, raw)
        assert out.shape == (N, C, L)
        # bf16 MXU operands (f32 accumulate) vs f32 reference -> loosened tolerance
        assert jnp.allclose(out, ref, atol=2e-2, rtol=2e-2), \
            f"mismatch vs JAX reference for shape {(N, C, L)}"
    print("KERNEL_OK")
</pallas_src>

<mosaic_0001>
module attributes {stable_mosaic.version = 11 : i64} {
  func.func @_mbconv_kernel(%arg0: i32, %arg1: memref<4x128xf32, #tpu.memory_space<vmem>>, %arg2: memref<16x4xbf16, #tpu.memory_space<vmem>>, %arg3: memref<4x16xbf16, #tpu.memory_space<vmem>>, %arg4: memref<16x8xf32, #tpu.memory_space<vmem>>, %arg5: memref<2x128xf32, #tpu.memory_space<vmem>>, %arg6: memref<4x128xf32, #tpu.memory_space<vmem>>) attributes {dimension_semantics = [#tpu.dimension_semantics<parallel>], iteration_bounds = array<i64: 1>, scalar_prefetch = 0 : i64, scratch_operands = 0 : i64, tpu.core_type = #tpu.core_type<tc>, window_params = [{transform_indices = @transform_0, window_bounds = array<i64: 4, 128>}, {pipeline_mode = #tpu.pipeline_mode<synchronous>, transform_indices = @transform_1, window_bounds = array<i64: 16, 4>}, {pipeline_mode = #tpu.pipeline_mode<synchronous>, transform_indices = @transform_2, window_bounds = array<i64: 4, 16>}, {pipeline_mode = #tpu.pipeline_mode<synchronous>, transform_indices = @transform_3, window_bounds = array<i64: 16, 8>}, {pipeline_mode = #tpu.pipeline_mode<synchronous>, transform_indices = @transform_4, window_bounds = array<i64: 2, 128>}, {transform_indices = @transform_5, window_bounds = array<i64: 4, 128>}]} {
    %c0 = arith.constant 0 : index
    %c0_0 = arith.constant 0 : index
    %0 = vector.load %arg1[%c0, %c0_0] : memref<4x128xf32, #tpu.memory_space<vmem>>, vector<4x128xf32>
    %c0_1 = arith.constant 0 : index
    %c0_2 = arith.constant 0 : index
    %1 = vector.load %arg2[%c0_1, %c0_2] : memref<16x4xbf16, #tpu.memory_space<vmem>>, vector<16x4xbf16>
    %2 = arith.truncf %0 : vector<4x128xf32> to vector<4x128xbf16>
    %cst = arith.constant dense<0.000000e+00> : vector<16x128xf32>
    %3 = tpu.matmul %1, %2, %cst {dimension_numbers = #tpu.dot_dimension_numbers<[1], [0], [0], [1], [0, 0, 1, 1], [], []>} : vector<16x4xbf16>, vector<4x128xbf16>, vector<16x128xf32> -> vector<16x128xf32>
    %c0_3 = arith.constant 0 : index
    %c3 = arith.constant 3 : index
    %4 = vector.load %arg4[%c0_3, %c3] : memref<16x8xf32, #tpu.memory_space<vmem>>, vector<16x1xf32>
    %5 = vector.broadcast %4 : vector<16x1xf32> to vector<16x128xf32>
    %6 = arith.addf %3, %5 : vector<16x128xf32>
    %7 = arith.negf %6 : vector<16x128xf32>
    %8 = math.exp %7 : vector<16x128xf32>
    %cst_4 = arith.constant 1.000000e+00 : f32
    %9 = vector.broadcast %cst_4 : f32 to vector<16x128xf32>
    %10 = arith.addf %9, %8 : vector<16x128xf32>
    %11 = arith.divf %9, %10 : vector<16x128xf32>
    %12 = arith.mulf %6, %11 : vector<16x128xf32>
    %c0_5 = arith.constant 0 : index
    %c0_6 = arith.constant 0 : index
    %13 = vector.load %arg5[%c0_5, %c0_6] : memref<2x128xf32, #tpu.memory_space<vmem>>, vector<1x128xf32>
    %c1 = arith.constant 1 : index
    %c0_7 = arith.constant 0 : index
    %14 = vector.load %arg5[%c1, %c0_7] : memref<2x128xf32, #tpu.memory_space<vmem>>, vector<1x128xf32>
    %c0_8 = arith.constant 0 : index
    %c1_9 = arith.constant 1 : index
    %15 = vector.load %arg4[%c0_8, %c1_9] : memref<16x8xf32, #tpu.memory_space<vmem>>, vector<16x1xf32>
    %16 = vector.broadcast %15 : vector<16x1xf32> to vector<16x128xf32>
    %17 = arith.mulf %16, %12 : vector<16x128xf32>
    %c0_10 = arith.constant 0 : index
    %c4 = arith.constant 4 : index
    %18 = vector.load %arg4[%c0_10, %c4] : memref<16x8xf32, #tpu.memory_space<vmem>>, vector<16x1xf32>
    %19 = vector.broadcast %18 : vector<16x1xf32> to vector<16x128xf32>
    %20 = arith.addf %17, %19 : vector<16x128xf32>
    %c0_11 = arith.constant 0 : index
    %c0_12 = arith.constant 0 : index
    %21 = vector.load %arg4[%c0_11, %c0_12] : memref<16x8xf32, #tpu.memory_space<vmem>>, vector<16x1xf32>
    %c1_i32 = arith.constant 1 : i32
    %22 = tpu.dynamic_rotate %12 by %c1_i32 dim 1 : vector<16x128xf32>, i32 -> vector<16x128xf32>
    %23 = vector.broadcast %13 : vector<1x128xf32> to vector<16x128xf32>
    %24 = arith.mulf %23, %22 : vector<16x128xf32>
    %25 = vector.broadcast %21 : vector<16x1xf32> to vector<16x128xf32>
    %26 = arith.mulf %25, %24 : vector<16x128xf32>
    %27 = arith.addf %20, %26 : vector<16x128xf32>
    %c0_13 = arith.constant 0 : index
    %c2 = arith.constant 2 : index
    %28 = vector.load %arg4[%c0_13, %c2] : memref<16x8xf32, #tpu.memory_space<vmem>>, vector<16x1xf32>
    %c127_i32 = arith.constant 127 : i32
    %29 = tpu.dynamic_rotate %12 by %c127_i32 dim 1 : vector<16x128xf32>, i32 -> vector<16x128xf32>
    %30 = vector.broadcast %14 : vector<1x128xf32> to vector<16x128xf32>
    %31 = arith.mulf %30, %29 : vector<16x128xf32>
    %32 = vector.broadcast %28 : vector<16x1xf32> to vector<16x128xf32>
    %33 = arith.mulf %32, %31 : vector<16x128xf32>
    %34 = arith.addf %27, %33 : vector<16x128xf32>
    %35 = arith.negf %34 : vector<16x128xf32>
    %36 = math.exp %35 : vector<16x128xf32>
    %cst_14 = arith.constant 1.000000e+00 : f32
    %37 = vector.broadcast %cst_14 : f32 to vector<16x128xf32>
    %38 = arith.addf %37, %36 : vector<16x128xf32>
    %39 = arith.divf %37, %38 : vector<16x128xf32>
    %40 = arith.mulf %34, %39 : vector<16x128xf32>
    %c0_15 = arith.constant 0 : index
    %c0_16 = arith.constant 0 : index
    %41 = vector.load %arg3[%c0_15, %c0_16] : memref<4x16xbf16, #tpu.memory_space<vmem>>, vector<4x16xbf16>
    %42 = arith.truncf %40 : vector<16x128xf32> to vector<16x128xbf16>
    %cst_17 = arith.constant dense<0.000000e+00> : vector<4x128xf32>
    %43 = tpu.matmul %41, %42, %cst_17 {dimension_numbers = #tpu.dot_dimension_numbers<[1], [0], [0], [1], [0, 0, 1, 1], [], []>} : vector<4x16xbf16>, vector<16x128xbf16>, vector<4x128xf32> -> vector<4x128xf32>
    %c0_18 = arith.constant 0 : index
    %c5 = arith.constant 5 : index
    %44 = vector.load %arg4[%c0_18, %c5] : memref<16x8xf32, #tpu.memory_space<vmem>>, vector<4x1xf32>
    %45 = vector.broadcast %44 : vector<4x1xf32> to vector<4x128xf32>
    %46 = arith.addf %43, %45 : vector<4x128xf32>
    %47 = arith.addf %46, %0 : vector<4x128xf32>
    %c0_19 = arith.constant 0 : index
    %c0_20 = arith.constant 0 : index
    %48 = vector.load %arg6[%c0_19, %c0_20] : memref<4x128xf32, #tpu.memory_space<vmem>>, vector<4x128xf32>
    tpu.vector_store %arg6[%c0_19, %c0_20], %47 {strides = array<i32>} : memref<4x128xf32, #tpu.memory_space<vmem>>, vector<4x128xf32>,
    return
  }
  func.func @transform_0(%arg0: i32) -> (i32, i32) {
    %c0_i32 = arith.constant 0 : i32
    %c0_i32_0 = arith.constant 0 : i32
    return %c0_i32, %arg0 : i32, i32
  }
  func.func @transform_1(%arg0: i32) -> (i32, i32) {
    %c0_i32 = arith.constant 0 : i32
    %c0_i32_0 = arith.constant 0 : i32
    %c0_i32_1 = arith.constant 0 : i32
    return %c0_i32, %c0_i32_0 : i32, i32
  }
  func.func @transform_2(%arg0: i32) -> (i32, i32) {
    %c0_i32 = arith.constant 0 : i32
    %c0_i32_0 = arith.constant 0 : i32
    %c0_i32_1 = arith.constant 0 : i32
    return %c0_i32, %c0_i32_0 : i32, i32
  }
  func.func @transform_3(%arg0: i32) -> (i32, i32) {
    %c0_i32 = arith.constant 0 : i32
    %c0_i32_0 = arith.constant 0 : i32
    %c0_i32_1 = arith.constant 0 : i32
    return %c0_i32, %c0_i32_0 : i32, i32
  }
  func.func @transform_4(%arg0: i32) -> (i32, i32) {
    %c0_i32 = arith.constant 0 : i32
    %c0_i32_0 = arith.constant 0 : i32
    %c0_i32_1 = arith.constant 0 : i32
    return %c0_i32, %c0_i32_0 : i32, i32
  }
  func.func @transform_5(%arg0: i32) -> (i32, i32) {
    %c0_i32 = arith.constant 0 : i32
    %c0_i32_0 = arith.constant 0 : i32
    return %c0_i32, %arg0 : i32, i32
  }
}

</mosaic_0001>

<bundles_post_ra>
// kernel: tpu_custom_call.1
= control target key start
LH: loop header
LB: loop body
LE: loop exit
PB: predicated region body
PF: predicated region fallthrough
CT: control target
= control target key end

     0   :  { %vm47_vm0 = vcmask 1041408   ;;  %v339_v1 = vmov 0.0   ;;  %vm340_vm1 = vmmov 0   ;;  %v341_v3 = vmov 3   ;;  %s423_s0 = inlined_call_operand.vmem [shape: f32[4,128], index: 0, kind: input, shape index: {}]   ;;  %s424_s1 = inlined_call_operand.vmem [shape: bf16[16,4], index: 1, kind: input, shape index: {}]   ;;  %s425_s2 = inlined_call_operand.vmem [shape: bf16[4,16], index: 2, kind: input, shape index: {}]   ;;  %s426_s3 = inlined_call_operand.vmem [shape: f32[16,8], index: 3, kind: input, shape index: {}]   ;;  %s427_s4 = inlined_call_operand.vmem [shape: f32[2,128], index: 4, kind: input, shape index: {}]   ;;  %s428_s5 = inlined_call_operand.hbm [shape: f32[4,128], index: 5, kind: output, shape index: {}]  }
   0x1   :  { %v383_v0 = vld [vmem:[%s423_s0] sm:$0xf]  ;;  %267 = vmatprep.subr.bf16.mxu0 %v339_v1  ;;  %269 = vmatprep.mubr.msk.bf16.mxu0 %vm340_vm1, %v339_v1 }
   0x2   :  { %v25_v2 = vpack.c.bf16 %v383_v0, %v383_v0  ;;  %290 = vset.pattern.permute.xlu0 %v341_v3  ;;  %v26_v4 = vld [vmem:[%s426_s3] sm:$0xff]  ;;  %273 = vmatprep.subr.bf16.mxu1 %v339_v1 }
   0x3   :  { %10 = vsyncpa [#allocation3], 0  ;;  %v298_v6 = vld [vmem:[%s424_s1] sm:$0xff]   ;;  %30 = vperm.xlu0 %290, %v26_v4   ;;  %v342_v7 = vmov 1   ;;  %vm43_vm2 = vcmask 31744   ;;  %v27_v8 = vld [vmem:[%s426_s3 + $0x8] sm:$0xff]  ;;  %275 = vmatprep.mubr.msk.bf16.mxu1 %vm340_vm1, %v339_v1 }
   0x4   :  { %v49_v5 = vsel %vm47_vm0, %v25_v2, 0  ;;  %291 = vset.pattern.permute.xlu1 %v342_v7  ;;  %v343_v9 = vmov 4   ;;  %v344_v10 = vmov 0   ;;  %v345_v11 = vmov 2   ;;  %s346_s1 = smov 1   ;;  %s347_s25 = smov 127  }
   0x5   :  { %268 = vmatpush3.bf16.msra.mxu0 %v49_v5  ;;  %109 = vperm.xlu1 %291, %v26_v4   ;;  %v188_v30 = vld [vmem:[%s426_s3] sm:$0xf]  ;;  %v348_v31 = vmov 5   ;;  %vm194_vm3 = vcmask 130048   ;;  %s349_s7 = smov [#allocation2]  }
   0x6   :  { %v258_v40 = vld [vmem:[%s427_s4] ss:$0 sm:$0xff]  ;;  %v259_v45 = vld [vmem:[%s427_s4 + $0x1] ss:$0 sm:$0xff]  ;;  %s246_s8 = sshll.u32 %s349_s7, 4  ;;  %s247_s8 = int_to_ptr.vmem [resolvable:$true] %s246_s8 }
   0x7   :  { %35 = vperm.xlu0 %290, %v27_v8   ;;  %s315_s9 = scalar_lea.vmem %s247_s8, 64  ;;  %p320_p1 = scmp.lt.s32.totalorder %s247_s8, %s247_s8 }
   0x8   :  { %270 = vmatmul.mubr.msk.bf16.vlgmr.msra.gmra.mrb[0].mxu0 %vm43_vm2, %v298_v6  ;;  %p316_p0 = scmp.ne.s32.totalorder %s247_s8, %s315_s9  ;;  %p321_p2 = scmp.lt.s32.totalorder %s315_s9, %s315_s9 }
   0x9   :  { %113 = vperm.xlu1 %291, %v27_v8  }
   0xa   :  { %p322_p3 = por %p321_p2, %p320_p1 }
   0xb   :  { %292 = vset.pattern.permute.xlu0 %v343_v9 }
   0xc   :  { %119 = vperm.xlu0 %292, %v26_v4   ;;  %p323_p4 = pnand %p322_p3, %p316_p0 }
   0xd   :  { %293 = vset.pattern.permute.xlu1 %v343_v9 }
   0xe   :  { %123 = vperm.xlu1 %293, %v27_v8  }
  0x10   :  { %295 = vset.pattern.permute.xlu0 %v344_v10 }
  0x11   :  { %143 = vperm.xlu0 %295, %v27_v8  }
  0x12   :  { %294 = vset.pattern.permute.xlu1 %v344_v10  ;;  %v186_v10 = vld [vmem:[%s425_s2] sm:$0x3] }
  0x13   :  { %139 = vperm.xlu1 %294, %v26_v4  }
  0x15   :  { %297 = vset.pattern.permute.xlu0 %v348_v31 }
  0x17   :  { %296 = vset.pattern.permute.xlu1 %v345_v11 }
  0x18   :  { %161 = vperm.xlu1 %296, %v26_v4  }
  0x1c   :  { %165 = vperm.xlu1 %296, %v27_v8  }
  0x82   :  { %v31_v12 = vpop.permute.xlu0 %30 }
  0x84   :  { %v110_v32 = vpop.permute.xlu1 %109 }
  0x86   :  { %v36_v16 = vpop.permute.xlu0 %35 }
  0x88   :  { %v114_v33 = vpop.permute.xlu1 %113 }
  0x8b   :  { %v120_v36 = vpop.permute.xlu0 %119 }
  0x8d   :  { %v124_v34 = vpop.permute.xlu1 %123 }
  0x90   :  { %v144_v38 = vpop.permute.xlu0 %143 }
  0x92   :  { %v140_v35 = vpop.permute.xlu1 %139 }
  0x97   :  { %v162_v37 = vpop.permute.xlu1 %161 }
  0x9b   :  { %v166_v39 = vpop.permute.xlu1 %165 }
  0xdb   :  { %v85_v13 = vpop.f32.mrb[0].mxu0 }
  0xdc   :  { %v86_v14 = vadd.f32 %v85_v13, %v31_v12  ;;  %v271_v15 = vpop.f32.mrb[1].mxu0 }
  0xdd   :  { %v88_v17 = vpop.f32.mrb[2].mxu0 }
  0xde   :  { %v256_v18 = vmul.f32 -1.442695, %v86_v14  ;;  %v89_v19 = vadd.f32 %v88_v17, %v36_v16  ;;  %v272_v20 = vpop.f32.mrb[3].mxu0 }
  0xe0   :  { %299 = vpow2.f32 %v256_v18  ;;  %v257_v21 = vmul.f32 -1.442695, %v89_v19 }
  0xe2   :  { %301 = vpow2.f32 %v257_v21 }
  0xea   :  { %v300_v22 = vpop.eup %299 }
  0xeb   :  { %v98_v23 = vadd.f32 1.0, %v300_v22 }
  0xec   :  { %v302_v24 = vpop.eup %301 }
  0xed   :  { %303 = vrcp.f32 %v98_v23  ;;  %v99_v25 = vadd.f32 1.0, %v302_v24 }
  0xef   :  { %305 = vrcp.f32 %v99_v25 }
  0xf7   :  { %v304_v26 = vpop.eup %303 }
  0xf8   :  { %v104_v27 = vmul.f32 %v304_v26, %v86_v14 }
  0xf9   :  { %v306_v28 = vpop.eup %305 }
  0xfa   :  { %v105_v29 = vmul.f32 %v306_v28, %v89_v19  ;;  %128 = vrot.lane.b32.xlu0 %v104_v27, %s346_s1  ;;  %v116_v42 = vmul.f32 %v110_v32, %v104_v27 }
  0xfc   :  { %130 = vrot.lane.b32.xlu1 %v105_v29, %s346_s1  ;;  %v117_v46 = vmul.f32 %v114_v33, %v105_v29  ;;  %v126_v50 = vadd.f32 %v120_v36, %v116_v42 }
  0xfe   :  { %150 = vrot.lane.b32.xlu0 %v104_v27, %s347_s25  ;;  %v127_v54 = vadd.f32 %v124_v34, %v117_v46 }
 0x100   :  { %152 = vrot.lane.b32.xlu1 %v105_v29, %s347_s25 }
 0x102   :  { %191 = vperm.xlu0 %297, %v188_v30  }
 0x16c   :  { %v129_v41 = vpop.permute.xlu0 %128 }
 0x16d   :  { %v136_v43 = vmul.f32 %v258_v40, %v129_v41 }
 0x16e   :  { %v131_v44 = vpop.permute.xlu1 %130 }
 0x16f   :  { %v146_v47 = vmul.f32 %v140_v35, %v136_v43  ;;  %v137_v48 = vmul.f32 %v258_v40, %v131_v44 }
 0x170   :  { %v151_v49 = vpop.permute.xlu0 %150 }
 0x171   :  { %v147_v51 = vmul.f32 %v144_v38, %v137_v48  ;;  %v158_v52 = vmul.f32 %v259_v45, %v151_v49  ;;  %v148_v55 = vadd.f32 %v146_v47, %v126_v50 }
 0x172   :  { %v153_v53 = vpop.permute.xlu1 %152 }
 0x173   :  { %v168_v56 = vmul.f32 %v162_v37, %v158_v52  ;;  %v159_v57 = vmul.f32 %v259_v45, %v153_v53  ;;  %v149_v58 = vadd.f32 %v147_v51, %v127_v54 }
 0x175   :  { %v170_v59 = vadd.f32 %v168_v56, %v148_v55  ;;  %v169_v60 = vmul.f32 %v166_v39, %v159_v57 }
 0x177   :  { %v260_v61 = vmul.f32 -1.442695, %v170_v59  ;;  %v171_v62 = vadd.f32 %v169_v60, %v149_v58 }
 0x179   :  { %307 = vpow2.f32 %v260_v61  ;;  %v261_v63 = vmul.f32 -1.442695, %v171_v62 }
 0x17b   :  { %309 = vpow2.f32 %v261_v63 }
 0x181   :  { %v192_v11 = vpop.permute.xlu0 %191 }
 0x183   :  { %v308_v1 = vpop.eup %307 }
 0x184   :  { %v178_v2 = vadd.f32 1.0, %v308_v1 }
 0x185   :  { %v310_v3 = vpop.eup %309 }
 0x186   :  { %311 = vrcp.f32 %v178_v2  ;;  %v179_v4 = vadd.f32 1.0, %v310_v3 }
 0x188   :  { %313 = vrcp.f32 %v179_v4 }
 0x190   :  { %v312_v5 = vpop.eup %311 }
 0x191   :  { %v184_v7 = vmul.f32 %v312_v5, %v170_v59 }
 0x192   :  { %v314_v6 = vpop.eup %313 }
 0x193   :  { %v185_v8 = vmul.f32 %v314_v6, %v171_v62 }
 0x195   :  { %v187_v9 = vpack.c.bf16 %v185_v8, %v184_v7 }
 0x197   :  { %274 = vmatpush3.bf16.msra.mxu1 %v187_v9 }
 0x19a   :  { %276 = vmatmul.mubr.msk.bf16.vlgmr.msra.gmra.mrb[0].mxu1 %vm194_vm3, %v186_v10 }
 0x26d   :  { %v232_v12 = vpop.f32.mrb[0].mxu1 }
 0x26e   :  { %v233_v13 = vadd.f32 %v232_v12, %v192_v11  ;;  %v277_v14 = vpop.f32.mrb[1].mxu1 }
 0x26f   :  { %v235_v15 = vpop.f32.mrb[2].mxu1 }
 0x270   :  { %v278_v16 = vpop.f32.mrb[3].mxu1  ;;  %v238_v17 = vadd.f32 %v233_v13, %v383_v0 }
 0x272   :  { %239 = vst [vmem:[#allocation2] sm:$0xf] %v238_v17 }
 0x273   :  { %326 = shalt.err (!%p323_p4)
}
 0x274   :  { %s327_s11 = scalar_lea.hbm %s428_s5, 64 }
 0x275   :  { %p328_p5 = scmp.ne.s32.totalorder %s428_s5, %s327_s11  ;;  %p331_p6 = scmp.lt.u32.totalorder %s327_s11, %s428_s5 }
 0x277   :  { %p333_p7 = pnand %p331_p6, %p328_p5 }
 0x279   :  { %336 = shalt.err (!%p333_p7)
}
 0x27a   :  { %249 = dma.vmem_to_hbm [thread:$0]  %s247_s8, 64, %s428_s5, [#allocation3]  }
 0x27b   :  { %337 = dma.done.wait [#allocation3], 64  }
 0x27c   :  { %338 = vsyncadd [#allocation3], 4294967232 }
 0x27d   :  { %253 = vsyncpa [#allocation3], 1 }

</bundles_post_ra>
